<compile_context>
chip_gen: v6e
topology: v6e:2x2x1
jax: 0.10.0
libtpu: 0.0.40
codegen_flags: <defaults>
</compile_context>

<pallas_src>
import functools
import math

import jax
import jax.numpy as jnp
from jax import lax
from jax.experimental import pallas as pl
from jax.experimental.pallas import tpu as pltpu

_LANE = 128
_GOLD = 0x9E3779B9   # golden-ratio odd constant (seed mixing)
_MIX1 = 0x85EBCA6B   # murmur3 fmix32 constants
_MIX2 = 0xC2B2AE35


def _gumbel_softmax_kernel(seed_ref, logits_ref, out_ref, *, inv_tau, hard):
    classes, blk_cols = logits_ref.shape

    # ---- Counter-based uniform(0,1) noise, one independent draw / element ----
    col0 = pl.program_id(0) * blk_cols                          # global column base
    col = lax.broadcasted_iota(jnp.int32, (classes, blk_cols), 1) + col0
    cls = lax.broadcasted_iota(jnp.int32, (classes, blk_cols), 0)
    idx = (col * classes + cls).astype(jnp.uint32)               # unique per element

    key = seed_ref[0].astype(jnp.uint32) * jnp.uint32(_GOLD) + jnp.uint32(1)
    h = idx ^ key
    h = h ^ (h >> 16)
    h = h * jnp.uint32(_MIX1)
    h = h ^ (h >> 13)
    h = h * jnp.uint32(_MIX2)
    h = h ^ (h >> 16)

    # Top 24 bits -> uniform strictly inside (0, 1); no clamps needed.
    u = ((h >> 8).astype(jnp.int32).astype(jnp.float32) + 0.5) * (1.0 / (1 << 24))
    g = -jnp.log(-jnp.log(u))                                    # Gumbel(0, 1)

    x = (logits_ref[...].astype(jnp.float32) + g) * inv_tau

    if hard:
        # Forward value of the straight-through path is onehot(argmax(x));
        # argmax(softmax(x)) == argmax(x), so skip exp/sum/divide entirely.
        m = jnp.max(x, axis=0, keepdims=True)
        first = jnp.min(jnp.where(x == m, cls, classes), axis=0, keepdims=True)
        y = jnp.where(cls == first, 1.0, 0.0)
    else:
        # Numerically stable softmax over the class (sublane) axis.
        m = jnp.max(x, axis=0, keepdims=True)
        e = jnp.exp(x - m)
        s = jnp.sum(e, axis=0, keepdims=True)
        y = e * (1.0 / s)                 # one divide per column, not per element

    out_ref[...] = y.astype(out_ref.dtype)


def gumbel_softmax(logits, seed, *, dim=-1, tau=1.0, hard=False):
    """Pallas TPU implementation of F.gumbel_softmax(logits, tau, hard, dim) fwd."""
    ndim = logits.ndim
    dim = dim % ndim

    # classes -> axis 0 (sublanes); everything else flattened -> lanes.
    xt = jnp.moveaxis(logits, dim, 0)
    classes = xt.shape[0]
    rows = math.prod(xt.shape[1:])
    x2 = xt.reshape(classes, rows)

    # Lane-tile size: multiple of 128, roughly <= 1 MiB per input block so the
    # double-buffered in+out blocks stay ~4 MiB (well under v5e's 16 MiB scoped
    # VMEM and v7x's 64 MiB physical VMEM), and at least two grid steps when
    # possible so pipelining / v7x megacore sharding have work to overlap/split.
    # NOTE: the class axis is never tiled (single-pass softmax needs it whole).
    if rows <= _LANE:
        tile_c = rows
    else:
        tile_c = max(_LANE, ((1 << 20) // (classes * 4)) // _LANE * _LANE)
        tile_c = min(tile_c, max(_LANE, pl.cdiv(rows, 2 * _LANE) * _LANE))
    grid = (pl.cdiv(rows, tile_c),)

    seed_arr = jnp.asarray([seed], dtype=jnp.int32)
    kern = functools.partial(
        _gumbel_softmax_kernel, inv_tau=float(1.0 / tau), hard=bool(hard))

    out2 = pl.pallas_call(
        kern,
        out_shape=jax.ShapeDtypeStruct((classes, rows), logits.dtype),
        grid_spec=pltpu.PrefetchScalarGridSpec(
            num_scalar_prefetch=1,
            grid=grid,
            in_specs=[pl.BlockSpec((classes, tile_c), lambda i, _seed: (0, i))],
            out_specs=pl.BlockSpec((classes, tile_c), lambda i, _seed: (0, i)),
        ),
        compiler_params=pltpu.CompilerParams(
            dimension_semantics=("parallel",)),
    )(seed_arr, x2)

    return jnp.moveaxis(out2.reshape(xt.shape), 0, dim)


if __name__ == "__main__":
    key = jax.random.PRNGKey(0)
    # NCHW-style logits; Gumbel-Softmax over dim=-1 (module default).
    logits = jax.random.normal(key, (2, 4, 16, 16), dtype=jnp.float32)

    # Soft samples (hard=False, tau=1): probability distributions along dim=-1.
    y_soft = gumbel_softmax(logits, seed=1234, dim=-1, tau=1.0, hard=False)
    y_soft = jax.block_until_ready(y_soft)
    assert y_soft.shape == logits.shape
    assert bool(jnp.all(jnp.isfinite(y_soft)))
    sums = jnp.sum(y_soft, axis=-1)
    assert jnp.allclose(sums, jnp.ones_like(sums), atol=1e-5)

    # Hard samples (hard=True): one-hot along dim=-1 (straight-through fwd value).
    y_hard = gumbel_softmax(logits, seed=1234, dim=-1, tau=1.0, hard=True)
    y_hard = jax.block_until_ready(y_hard)
    assert jnp.allclose(jnp.sum(y_hard, axis=-1), 1.0)
    assert bool(jnp.all((y_hard == 0.0) | (y_hard == 1.0)))

    # Non-default dim with a multi-tile grid (classes=4 on dim=1, rows=512).
    y_dim1 = gumbel_softmax(logits, seed=7, dim=1, tau=0.5, hard=False)
    y_dim1 = jax.block_until_ready(y_dim1)
    s1 = jnp.sum(y_dim1, axis=1)
    assert jnp.allclose(s1, jnp.ones_like(s1), atol=1e-5)

    print("KERNEL_OK")
</pallas_src>

<mosaic_0001>
module attributes {stable_mosaic.version = 11 : i64} {
  func.func @_gumbel_softmax_kernel(%arg0: i32, %arg1: memref<1xi32, #tpu.memory_space<smem>>, %arg2: memref<16x128xf32, #tpu.memory_space<vmem>>, %arg3: memref<16x128xf32, #tpu.memory_space<vmem>>) attributes {dimension_semantics = [#tpu.dimension_semantics<parallel>], iteration_bounds = array<i64: 1>, scalar_prefetch = 1 : i64, scratch_operands = 0 : i64, tpu.core_type = #tpu.core_type<tc>, window_params = [{transform_indices = @transform_0, window_bounds = array<i64: 16, 128>}, {transform_indices = @transform_1, window_bounds = array<i64: 16, 128>}]} {
    %c128_i32 = arith.constant 128 : i32
    %0 = arith.muli %arg0, %c128_i32 : i32
    %1 = tpu.iota {dimensions = array<i32: 1>} : vector<16x128xi32>
    %2 = vector.broadcast %0 : i32 to vector<16x128xi32>
    %3 = arith.addi %1, %2 : vector<16x128xi32>
    %4 = tpu.iota {dimensions = array<i32: 0>} : vector<16x128xi32>
    %c16_i32 = arith.constant 16 : i32
    %5 = vector.broadcast %c16_i32 : i32 to vector<16x128xi32>
    %6 = arith.muli %3, %5 : vector<16x128xi32>
    %7 = arith.addi %6, %4 : vector<16x128xi32>
    %c0 = arith.constant 0 : index
    %8 = memref.load %arg1[%c0] : memref<1xi32, #tpu.memory_space<smem>>
    %c-1640531527_i32 = arith.constant -1640531527 : i32
    %9 = arith.muli %8, %c-1640531527_i32 : i32
    %c1_i32 = arith.constant 1 : i32
    %10 = arith.addi %9, %c1_i32 : i32
    %11 = vector.broadcast %10 : i32 to vector<16x128xi32>
    %12 = arith.xori %7, %11 : vector<16x128xi32>
    %c16_i32_0 = arith.constant 16 : i32
    %13 = vector.broadcast %c16_i32_0 : i32 to vector<16x128xi32>
    %14 = arith.shrui %12, %13 : vector<16x128xi32>
    %15 = arith.xori %12, %14 : vector<16x128xi32>
    %c-2048144789_i32 = arith.constant -2048144789 : i32
    %16 = vector.broadcast %c-2048144789_i32 : i32 to vector<16x128xi32>
    %17 = arith.muli %15, %16 : vector<16x128xi32>
    %c13_i32 = arith.constant 13 : i32
    %18 = vector.broadcast %c13_i32 : i32 to vector<16x128xi32>
    %19 = arith.shrui %17, %18 : vector<16x128xi32>
    %20 = arith.xori %17, %19 : vector<16x128xi32>
    %c-1028477387_i32 = arith.constant -1028477387 : i32
    %21 = vector.broadcast %c-1028477387_i32 : i32 to vector<16x128xi32>
    %22 = arith.muli %20, %21 : vector<16x128xi32>
    %c16_i32_1 = arith.constant 16 : i32
    %23 = vector.broadcast %c16_i32_1 : i32 to vector<16x128xi32>
    %24 = arith.shrui %22, %23 : vector<16x128xi32>
    %25 = arith.xori %22, %24 : vector<16x128xi32>
    %c8_i32 = arith.constant 8 : i32
    %26 = vector.broadcast %c8_i32 : i32 to vector<16x128xi32>
    %27 = arith.shrui %25, %26 : vector<16x128xi32>
    %28 = arith.sitofp %27 : vector<16x128xi32> to vector<16x128xf32>
    %cst = arith.constant 5.000000e-01 : f32
    %29 = vector.broadcast %cst : f32 to vector<16x128xf32>
    %30 = arith.addf %28, %29 : vector<16x128xf32>
    %cst_2 = arith.constant 5.96046448E-8 : f32
    %31 = vector.broadcast %cst_2 : f32 to vector<16x128xf32>
    %32 = arith.mulf %30, %31 : vector<16x128xf32>
    %33 = math.log %32 : vector<16x128xf32>
    %cst_3 = arith.constant 0.000000e+00 : f32
    %34 = vector.broadcast %cst_3 : f32 to vector<16x128xf32>
    %35 = arith.subf %34, %33 : vector<16x128xf32>
    %36 = math.log %35 : vector<16x128xf32>
    %cst_4 = arith.constant 0.000000e+00 : f32
    %37 = vector.broadcast %cst_4 : f32 to vector<16x128xf32>
    %38 = arith.subf %37, %36 : vector<16x128xf32>
    %c0_5 = arith.constant 0 : index
    %c0_6 = arith.constant 0 : index
    %39 = vector.load %arg2[%c0_5, %c0_6] : memref<16x128xf32, #tpu.memory_space<vmem>>, vector<16x128xf32>
    %40 = arith.addf %39, %38 : vector<16x128xf32>
    %cst_7 = arith.constant 1.000000e+00 : f32
    %41 = vector.broadcast %cst_7 : f32 to vector<16x128xf32>
    %42 = arith.mulf %40, %41 : vector<16x128xf32>
    %cst_8 = arith.constant dense<0xFF800000> : vector<128xf32>
    %43 = vector.multi_reduction <maximumf>, %42, %cst_8 [0] : vector<16x128xf32> to vector<128xf32>
    %44 = vector.shape_cast %43 : vector<128xf32> to vector<1x128xf32>
    %45 = vector.broadcast %44 : vector<1x128xf32> to vector<16x128xf32>
    %46 = arith.subf %42, %45 : vector<16x128xf32>
    %47 = math.exp %46 : vector<16x128xf32>
    %cst_9 = arith.constant dense<0.000000e+00> : vector<128xf32>
    %48 = vector.multi_reduction <add>, %47, %cst_9 [0] : vector<16x128xf32> to vector<128xf32>
    %49 = vector.shape_cast %48 : vector<128xf32> to vector<1x128xf32>
    %cst_10 = arith.constant 1.000000e+00 : f32
    %50 = vector.broadcast %cst_10 : f32 to vector<1x128xf32>
    %51 = arith.divf %50, %49 : vector<1x128xf32>
    %52 = vector.broadcast %51 : vector<1x128xf32> to vector<16x128xf32>
    %53 = arith.mulf %47, %52 : vector<16x128xf32>
    %c0_11 = arith.constant 0 : index
    %c0_12 = arith.constant 0 : index
    %54 = vector.load %arg3[%c0_11, %c0_12] : memref<16x128xf32, #tpu.memory_space<vmem>>, vector<16x128xf32>
    tpu.vector_store %arg3[%c0_11, %c0_12], %53 {strides = array<i32>} : memref<16x128xf32, #tpu.memory_space<vmem>>, vector<16x128xf32>,
    return
  }
  func.func @transform_0(%arg0: i32, %arg1: memref<1xi32, #tpu.memory_space<smem>>) -> (i32, i32) {
    %c0_i32 = arith.constant 0 : i32
    %c0_i32_0 = arith.constant 0 : i32
    return %c0_i32, %arg0 : i32, i32
  }
  func.func @transform_1(%arg0: i32, %arg1: memref<1xi32, #tpu.memory_space<smem>>) -> (i32, i32) {
    %c0_i32 = arith.constant 0 : i32
    %c0_i32_0 = arith.constant 0 : i32
    return %c0_i32, %arg0 : i32, i32
  }
}

</mosaic_0001>

<bundles_post_ra>
// kernel: tpu_custom_call.1
= control target key start
LH: loop header
LB: loop body
LE: loop exit
PB: predicated region body
PF: predicated region fallthrough
CT: control target
= control target key end

     0   :  { %8 = vsyncpa [#allocation5], 0  ;;  %s221_s0 = inlined_call_operand.<no memory space> [shape: s32[1], index: 0, kind: input, shape index: {}]   ;;  %s222_s1 = inlined_call_operand.hbm [shape: f32[16,128], index: 1, kind: input, shape index: {}]   ;;  %s223_s2 = inlined_call_operand.hbm [shape: f32[16,128], index: 2, kind: output, shape index: {}]  }
   0x1   :  { %9 = vsyncpa [#allocation6], 0  ;;  %s187_s9 = smov [#allocation4]  }
   0x2   :  { %s15_s10 = sshll.u32 %s187_s9, 4  ;;  %s16_s10 = int_to_ptr.vmem [resolvable:$true] %s15_s10 }
   0x3   :  { %s151_s11 = scalar_lea.vmem %s16_s10, 256  ;;  %p156_p1 = scmp.lt.s32.totalorder %s16_s10, %s16_s10 }
   0x4   :  { %p152_p0 = scmp.ne.s32.totalorder %s16_s10, %s151_s11  ;;  %p157_p2 = scmp.lt.s32.totalorder %s151_s11, %s151_s11 }
   0x6   :  { %p158_p3 = por %p157_p2, %p156_p1 }
   0x8   :  { %p159_p4 = pnand %p158_p3, %p152_p0 }
   0xa   :  { %162 = shalt.err (!%p159_p4)
}
   0xb   :  { %s188_s12 = smov 128   ;;  %s189_s13 = smov 8  }
   0xc   :  { %21 = dma.hbm_to_vmem [thread:$0]  %s222_s1, 256, %s16_s10, [#allocation5], %s188_s12, %s188_s12, %s189_s13  }
   0xd   :  { %183 = dma.done.wait [#allocation5], 256  }
   0xe   :  { %184 = vsyncadd [#allocation5], 4294967040  ;;  %v26_v0 = vlaneseq  ;;  %s37_s18 = smul.u32 2654435769, %s221_s0  ;;  %v78_v44 = vld [vmem:[#allocation4] sm:$0xff]  ;;  %v79_v46 = vld [vmem:[#allocation4 + $0x8] sm:$0xff] }
   0xf   :  { %s190_s0 = smov [#allocation7]  }
  0x10   :  { %v27_v1 = vand.u32 127, %v26_v0  ;;  %v31_v2 = vshrl.u32 %v26_v0, 7  ;;  %s38_s19 = sadd.s32 1, %s37_s18  ;;  %s113_s1 = sshll.u32 %s190_s0, 4  ;;  %s114_s1 = int_to_ptr.vmem [resolvable:$true] %s113_s1 }
  0x11   :  { %v39_v5 = vstv %s38_s19  ;;  %s163_s20 = scalar_lea.vmem %s114_s1, 256  ;;  %p168_p6 = scmp.lt.s32.totalorder %s114_s1, %s114_s1 }
  0x12   :  { %v32_v3 = vadd.s32 8, %v31_v2  ;;  %v33_v4 = vmul.u32 16, %v27_v1  ;;  %p164_p5 = scmp.ne.s32.totalorder %s114_s1, %s163_s20  ;;  %p169_p7 = scmp.lt.s32.totalorder %s163_s20, %s163_s20 }
  0x14   :  { %v34_v6 = vadd.s32 %v33_v4, %v31_v2  ;;  %v35_v7 = vadd.s32 %v33_v4, %v32_v3  ;;  %p170_p8 = por %p169_p7, %p168_p6 }
  0x16   :  { %v40_v8 = vxor.u32 %v39_v5, %v34_v6  ;;  %v41_v9 = vxor.u32 %v39_v5, %v35_v7  ;;  %p171_p9 = pnand %p170_p8, %p164_p5 }
  0x18   :  { %v42_v10 = vshrl.u32 %v40_v8, 16  ;;  %v43_v11 = vshrl.u32 %v41_v9, 16 }
  0x1a   :  { %v44_v12 = vxor.u32 %v42_v10, %v40_v8  ;;  %v45_v13 = vxor.u32 %v43_v11, %v41_v9 }
  0x1c   :  { %v46_v14 = vmul.u32 2246822507, %v44_v12  ;;  %v47_v15 = vmul.u32 2246822507, %v45_v13 }
  0x1e   :  { %v48_v16 = vshrl.u32 %v46_v14, 13  ;;  %v49_v17 = vshrl.u32 %v47_v15, 13 }
  0x20   :  { %v50_v18 = vxor.u32 %v48_v16, %v46_v14  ;;  %v51_v19 = vxor.u32 %v49_v17, %v47_v15 }
  0x22   :  { %v52_v20 = vmul.u32 3266489909, %v50_v18  ;;  %v53_v21 = vmul.u32 3266489909, %v51_v19 }
  0x24   :  { %v54_v22 = vshrl.u32 %v52_v20, 16  ;;  %v55_v23 = vshrl.u32 %v53_v21, 16 }
  0x26   :  { %v56_v24 = vxor.u32 %v54_v22, %v52_v20  ;;  %v57_v25 = vxor.u32 %v55_v23, %v53_v21 }
  0x28   :  { %v58_v26 = vshrl.u32 %v56_v24, 8  ;;  %v59_v27 = vshrl.u32 %v57_v25, 8 }
  0x2a   :  { %v60_v28 = vcvt.s32.f32 %v58_v26  ;;  %v61_v29 = vcvt.s32.f32 %v59_v27 }
  0x2c   :  { %v62_v30 = vadd.f32 0.5, %v60_v28  ;;  %v63_v31 = vadd.f32 0.5, %v61_v29 }
  0x2e   :  { %v64_v32 = vmul.f32 5.9604645e-08, %v62_v30  ;;  %v65_v33 = vmul.f32 5.9604645e-08, %v63_v31 }
  0x30   :  { %129 = vlog2.f32 %v64_v32 }
  0x31   :  { %131 = vlog2.f32 %v65_v33 }
  0x3d   :  { %v130_v34 = vpop.eup %129 }
  0x3e   :  { %v132_v35 = vpop.eup %131  ;;  %v67_v36 = vmul.f32 0.6931472, %v130_v34 }
  0x3f   :  { %v69_v37 = vmul.f32 0.6931472, %v132_v35 }
  0x40   :  { %v70_v38 = vsub.f32 0.0, %v67_v36 }
  0x41   :  { %v71_v39 = vsub.f32 0.0, %v69_v37 }
  0x42   :  { %133 = vlog2.f32 %v70_v38 }
  0x43   :  { %135 = vlog2.f32 %v71_v39 }
  0x4f   :  { %v134_v40 = vpop.eup %133 }
  0x50   :  { %v136_v41 = vpop.eup %135  ;;  %v73_v42 = vmul.f32 0.6931472, %v134_v40 }
  0x51   :  { %v75_v43 = vmul.f32 0.6931472, %v136_v41 }
  0x52   :  { %v76_v45 = vsub.f32 0.0, %v73_v42 }
  0x53   :  { %v77_v47 = vsub.f32 0.0, %v75_v43 }
  0x54   :  { %v80_v48 = vadd.f32 %v78_v44, %v76_v45 }
  0x55   :  { %v81_v49 = vadd.f32 %v79_v46, %v77_v47 }
  0x57   :  { %v82_v50 = vmax.f32 %v80_v48, %v81_v49 }
  0x59   :  { %v83_v51 = vrot.slane %v82_v50, 4 }
  0x5b   :  { %v84_v52 = vmax.f32 %v82_v50, %v83_v51 }
  0x5d   :  { %v85_v53 = vrot.slane %v84_v52, 2 }
  0x5f   :  { %v86_v54 = vmax.f32 %v84_v52, %v85_v53 }
  0x61   :  { %v87_v55 = vrot.slane %v86_v54, 1 }
  0x63   :  { %v88_v56 = vmax.f32 %v86_v54, %v87_v55 }
  0x65   :  { %v89_v57 = vsub.f32 %v80_v48, %v88_v56  ;;  %v90_v58 = vsub.f32 %v81_v49, %v88_v56 }
  0x67   :  { %v91_v59 = vmul.f32 1.442695, %v89_v57  ;;  %v93_v60 = vmul.f32 1.442695, %v90_v58 }
  0x69   :  { %137 = vpow2.f32 %v91_v59 }
  0x6a   :  { %139 = vpow2.f32 %v93_v60 }
  0x76   :  { %v138_v61 = vpop.eup %137 }
  0x77   :  { %v140_v62 = vpop.eup %139 }
  0x78   :  { %v95_v63 = vadd.f32 %v140_v62, %v138_v61 }
  0x7a   :  { %v96_v0 = vrot.slane %v95_v63, 4 }
  0x7c   :  { %v97_v1 = vadd.f32 %v96_v0, %v95_v63 }
  0x7e   :  { %v98_v2 = vrot.slane %v97_v1, 2 }
  0x80   :  { %v99_v3 = vadd.f32 %v98_v2, %v97_v1 }
  0x82   :  { %v100_v4 = vrot.slane %v99_v3, 1 }
  0x84   :  { %v101_v5 = vadd.f32 %v100_v4, %v99_v3 }
  0x86   :  { %141 = vrcp.f32 %v101_v5 }
  0x93   :  { %v142_v6 = vpop.eup %141 }
  0x94   :  { %v104_v7 = vmul.f32 %v142_v6, %v138_v61  ;;  %v105_v8 = vmul.f32 %v142_v6, %v140_v62 }
  0x96   :  { %106 = vst [vmem:[#allocation7] sm:$0xff] %v104_v7  ;;  %107 = vst [vmem:[#allocation7 + $0x8] sm:$0xff] %v105_v8 }
  0x97   :  { %174 = shalt.err (!%p171_p9)
}
  0x98   :  { %119 = dma.vmem_to_hbm [thread:$0]  %s114_s1, 256, %s223_s2, [#allocation6], %s188_s12, %s188_s12, %s189_s13  }
  0x99   :  { %185 = dma.done.wait [#allocation6], 256  }
  0x9a   :  { %186 = vsyncadd [#allocation6], 4294967040 }
  0x9b   :  { %123 = vsyncpa [#allocation5], 1 }
  0x9c   :  { %124 = vsyncpa [#allocation6], 1 }

</bundles_post_ra>
